<compile_context>
chip_gen: v5e
topology: v5e:2x2
jax: 0.10.0
libtpu: 0.0.40
codegen_flags: <defaults>
</compile_context>

<pallas_src>
import functools

import jax
import jax.numpy as jnp
from jax import lax
from jax.experimental import pallas as pl
from jax.experimental.pallas import tpu as pltpu


def _mod_const(x, m):
    """x mod m for a compile-time positive int m (bitwise path for powers of 2)."""
    if m & (m - 1) == 0:
        return jnp.bitwise_and(x, m - 1)
    return lax.rem(x, jnp.int32(m))


def idsc_kernel(x_ref, w0_ref, par_ref, w2_ref, o_ref, *, cin_p, cout_p, width, hw):
    # Per grid step:
    #   x_ref   : (Cin_p, L)          input slab, L = B_TILE*H*W on lanes
    #   w0_ref  : (Cin_p, Cin_p)      1x1 conv weight, (out, in), zero-padded
    #   par_ref : (Cmax_p, 16)        cols 0..8 depthwise taps * BN1 scale,
    #                                 9 conv0 bias, 10 BN1 scale, 11 BN1 shift,
    #                                 12 BN2 shift
    #   w2_ref  : (Cout_p, 9*Cin_p)   conv2 weight * BN2 scale, tap-major cols
    #   o_ref   : (Cout_p, L)         output slab (lane-dense)
    _, lanes = x_ref.shape

    # Per-lane within-image coordinates, in registers (no mask input stream).
    idx = lax.broadcasted_iota(jnp.int32, (1, lanes), 1)
    pos = _mod_const(idx, hw)        # flat position inside its own image
    col = _mod_const(idx, width)     # column inside its own image

    def shifted(v, dy, dx):
        """'same'-padded 3x3 neighbour (dy, dx) of v; NaN/Inf-safe at borders."""
        d = dy * width + dx
        if d == 0:
            return v
        r = pltpu.roll(v, shift=(-d) % lanes, axis=1)     # XLU lane rotation
        m = None
        if dy == -1:
            m = pos >= width
        elif dy == 1:
            m = pos < hw - width
        if dx == -1:
            c = col >= 1
            m = c if m is None else m & c
        elif dx == 1:
            c = col < width - 1
            m = c if m is None else m & c
        return jnp.where(m, r, 0.0)

    P = par_ref[...]
    b0 = P[0:cin_p, 9:10]
    s1 = P[0:cin_p, 10:11]
    t1 = P[0:cin_p, 11:12]
    t2 = P[0:cout_p, 12:13]

    x = x_ref[...]                                        # (Cin_p, L)

    # ---------- conv0 (1x1 + bias) -> ReLU -> BN1 ----------
    h = jnp.dot(w0_ref[...], x, preferred_element_type=jnp.float32)
    h = jnp.maximum(h + b0, 0.0) * s1 + t1

    # ---------- conv1 (3x3 depthwise, 'same') -> BN1 -> ReLU ----------
    # BN1 scale pre-folded into the per-channel taps (params cols 0..8).
    y = P[0:cin_p, 4:5] * h                               # center tap, no roll
    for t in range(9):
        if t == 4:
            continue
        y = y + P[0:cin_p, t:t + 1] * shifted(h, t // 3 - 1, t % 3 - 1)
    y = jnp.maximum(y + t1, 0.0)

    # ---------- conv2 (3x3 dense, 'same') -> BN2 -> ReLU : ONE matmul ----------
    # im2col assembled in registers (9 aligned 8-row pieces), no VMEM scratch.
    cols = jnp.concatenate(
        [shifted(y, t // 3 - 1, t % 3 - 1) for t in range(9)], axis=0)
    z = jnp.dot(w2_ref[...], cols, preferred_element_type=jnp.float32)
    o_ref[...] = jnp.maximum(z + t2, 0.0)


@jax.jit
def idsc_forward(x_nchw, w0, b0, s1, t1, w1, w2, s2, t2):
    """x_nchw: (N, Cin, H, W) float32 -> (N, Cout, H, W) float32."""
    n, cin, h, w = x_nchw.shape
    cout = w2.shape[-1]
    hw = h * w

    cin_p = -(-cin // 8) * 8
    cout_p = -(-cout // 8) * 8
    cmax_p = max(cin_p, cout_p)

    # NCHW -> (Cin_p, N*H*W): channels on sublanes, batch folded into lanes.
    x2 = jnp.transpose(x_nchw, (1, 0, 2, 3)).reshape(cin, n * hw)
    x2 = jnp.pad(x2, ((0, cin_p - cin), (0, 0)))

    # 1x1 conv weight, sublane-aligned.
    w0_p = jnp.pad(w0, ((0, cin_p - cin), (0, cin_p - cin)))

    # One tiny params tile (pads to a single (8,128) VMEM tile).
    w1_taps = w1.reshape(9, cin) * s1[None, :]            # BN1 scale folded
    par = jnp.zeros((cmax_p, 16), jnp.float32)
    par = par.at[:cin, 0:9].set(w1_taps.T)
    par = par.at[:cin, 9].set(b0)
    par = par.at[:cin, 10].set(s1)
    par = par.at[:cin, 11].set(t1)
    par = par.at[:cout, 12].set(t2)

    # conv2 weight with BN2 scale folded, tap-major columns, padded channels.
    w2s = (w2 * s2[None, None, None, :]).reshape(9, cin, cout)
    w2s = jnp.pad(w2s, ((0, 0), (0, cin_p - cin), (0, cout_p - cout)))
    w2_mat = jnp.transpose(w2s, (2, 0, 1)).reshape(cout_p, 9 * cin_p)

    # Batch tiling: fold as many images into one grid step as a modest VMEM
    # budget allows (amortizes per-step overhead, fattens the matmul lane dim).
    bytes_per_lane = 4 * (12 * cin_p + 2 * cout_p)        # x, h, y, im2col, out
    vmem_budget = 4 * 1024 * 1024
    b_tile = 1
    for d in range(1, n + 1):
        if n % d == 0 and d * hw * bytes_per_lane <= vmem_budget:
            b_tile = d
    if hw % 128 != 0:
        b_tile = n     # lane blocks must be 128-aligned unless they span everything
    lanes = b_tile * hw
    grid = (n // b_tile,)

    kernel = functools.partial(idsc_kernel, cin_p=cin_p, cout_p=cout_p,
                               width=w, hw=hw)
    out = pl.pallas_call(
        kernel,
        out_shape=jax.ShapeDtypeStruct((cout_p, n * hw), jnp.float32),
        grid_spec=pltpu.PrefetchScalarGridSpec(
            num_scalar_prefetch=0,
            grid=grid,
            in_specs=[
                pl.BlockSpec((cin_p, lanes), lambda i: (0, i)),
                pl.BlockSpec((cin_p, cin_p), lambda i: (0, 0)),
                pl.BlockSpec((cmax_p, 16), lambda i: (0, 0)),
                pl.BlockSpec((cout_p, 9 * cin_p), lambda i: (0, 0)),
            ],
            out_specs=pl.BlockSpec((cout_p, lanes), lambda i: (0, i)),
        ),
        compiler_params=pltpu.CompilerParams(
            dimension_semantics=("parallel",),
            vmem_limit_bytes=32 * 1024 * 1024),
    )(x2, w0_p, par, w2_mat)

    out = out[:cout].reshape(cout, n, h, w)
    return jnp.transpose(out, (1, 0, 2, 3))


def reference_forward(x_nchw, w0, b0, s1, t1, w1, w2, s2, t2):
    """Pure-JAX reference using lax.conv_general_dilated (NHWC / HWIO)."""
    x = jnp.transpose(x_nchw, (0, 2, 3, 1))               # NHWC
    cin = x.shape[-1]
    dn = ("NHWC", "HWIO", "NHWC")

    w0_hwio = jnp.transpose(w0)[None, None]               # (1,1,in,out)
    h = lax.conv_general_dilated(x, w0_hwio, (1, 1), "SAME",
                                 dimension_numbers=dn) + b0
    h = jnp.maximum(h, 0.0) * s1 + t1

    w1_hwio = w1[:, :, None, :]                           # (3,3,1,Cin)
    y = lax.conv_general_dilated(h, w1_hwio, (1, 1), "SAME",
                                 dimension_numbers=dn,
                                 feature_group_count=cin)
    y = jnp.maximum(y * s1 + t1, 0.0)

    z = lax.conv_general_dilated(y, w2, (1, 1), "SAME", dimension_numbers=dn)
    z = jnp.maximum(z * s2 + t2, 0.0)
    return jnp.transpose(z, (0, 3, 1, 2))                 # back to NCHW


def make_params(key, cin, cout):
    ks = jax.random.split(key, 10)
    eps = 1e-5
    w0 = jax.random.normal(ks[0], (cin, cin), jnp.float32) * 0.2     # (out, in)
    b0 = jax.random.normal(ks[1], (cin,), jnp.float32) * 0.1
    w1 = jax.random.normal(ks[2], (3, 3, cin), jnp.float32) * 0.2    # depthwise taps
    w2 = jax.random.normal(ks[3], (3, 3, cin, cout), jnp.float32) * 0.2
    # bn1 / bn2 (eval mode): fold gamma/beta/running stats into scale & shift
    g1 = 1.0 + 0.1 * jax.random.normal(ks[4], (cin,), jnp.float32)
    be1 = 0.1 * jax.random.normal(ks[5], (cin,), jnp.float32)
    m1 = 0.1 * jax.random.normal(ks[6], (cin,), jnp.float32)
    v1 = jnp.abs(jax.random.normal(ks[7], (cin,), jnp.float32)) + 0.5
    s1 = g1 / jnp.sqrt(v1 + eps)
    t1 = be1 - m1 * s1
    g2 = 1.0 + 0.1 * jax.random.normal(ks[8], (cout,), jnp.float32)
    be2 = 0.1 * jax.random.normal(ks[9], (cout,), jnp.float32)
    s2 = g2 / jnp.sqrt(1.0 + eps)                                    # m2=0, v2=1
    t2 = be2
    return w0, b0, s1, t1, w1, w2, s2, t2


if __name__ == "__main__":
    N, Cin, Cout, H, W = 2, 4, 8, 16, 16

    key = jax.random.PRNGKey(0)
    kx, kp = jax.random.split(key)
    x = jax.random.normal(kx, (N, Cin, H, W), jnp.float32)           # NCHW input
    params = make_params(kp, Cin, Cout)

    out = jax.block_until_ready(idsc_forward(x, *params))
    ref = reference_forward(x, *params)

    assert out.shape == (N, Cout, H, W)
    max_err = float(jnp.max(jnp.abs(out - ref)))
    assert jnp.allclose(out, ref, rtol=1e-3, atol=1e-3), max_err

    print("KERNEL_OK")
</pallas_src>

<mosaic_0001>
module attributes {stable_mosaic.version = 11 : i64} {
  func.func @idsc_kernel(%arg0: i32, %arg1: memref<8x512xf32, #tpu.memory_space<vmem>>, %arg2: memref<8x8xf32, #tpu.memory_space<vmem>>, %arg3: memref<8x16xf32, #tpu.memory_space<vmem>>, %arg4: memref<8x72xf32, #tpu.memory_space<vmem>>, %arg5: memref<8x512xf32, #tpu.memory_space<vmem>>) attributes {dimension_semantics = [#tpu.dimension_semantics<parallel>], iteration_bounds = array<i64: 1>, scalar_prefetch = 0 : i64, scratch_operands = 0 : i64, tpu.core_type = #tpu.core_type<tc>, window_params = [{transform_indices = @transform_0, window_bounds = array<i64: 8, 512>}, {pipeline_mode = #tpu.pipeline_mode<synchronous>, transform_indices = @transform_1, window_bounds = array<i64: 8, 8>}, {pipeline_mode = #tpu.pipeline_mode<synchronous>, transform_indices = @transform_2, window_bounds = array<i64: 8, 16>}, {pipeline_mode = #tpu.pipeline_mode<synchronous>, transform_indices = @transform_3, window_bounds = array<i64: 8, 72>}, {transform_indices = @transform_4, window_bounds = array<i64: 8, 512>}]} {
    %0 = tpu.iota {dimensions = array<i32: 1>} : vector<1x512xi32>
    %c255_i32 = arith.constant 255 : i32
    %1 = vector.broadcast %c255_i32 : i32 to vector<1x512xi32>
    %2 = arith.andi %0, %1 : vector<1x512xi32>
    %c15_i32 = arith.constant 15 : i32
    %3 = vector.broadcast %c15_i32 : i32 to vector<1x512xi32>
    %4 = arith.andi %0, %3 : vector<1x512xi32>
    %c0 = arith.constant 0 : index
    %c0_0 = arith.constant 0 : index
    %5 = vector.load %arg3[%c0, %c0_0] : memref<8x16xf32, #tpu.memory_space<vmem>>, vector<8x16xf32>
    %6 = vector.extract_strided_slice %5 {offsets = [0, 9], sizes = [8, 1], strides = [1, 1]} : vector<8x16xf32> to vector<8x1xf32>
    %7 = vector.extract_strided_slice %5 {offsets = [0, 10], sizes = [8, 1], strides = [1, 1]} : vector<8x16xf32> to vector<8x1xf32>
    %8 = vector.extract_strided_slice %5 {offsets = [0, 11], sizes = [8, 1], strides = [1, 1]} : vector<8x16xf32> to vector<8x1xf32>
    %9 = vector.extract_strided_slice %5 {offsets = [0, 12], sizes = [8, 1], strides = [1, 1]} : vector<8x16xf32> to vector<8x1xf32>
    %c0_1 = arith.constant 0 : index
    %c0_2 = arith.constant 0 : index
    %10 = vector.load %arg1[%c0_1, %c0_2] : memref<8x512xf32, #tpu.memory_space<vmem>>, vector<8x512xf32>
    %c0_3 = arith.constant 0 : index
    %c0_4 = arith.constant 0 : index
    %11 = vector.load %arg2[%c0_3, %c0_4] : memref<8x8xf32, #tpu.memory_space<vmem>>, vector<8x8xf32>
    %cst = arith.constant dense<0.000000e+00> : vector<8x512xf32>
    %12 = tpu.matmul %11, %10, %cst {dimension_numbers = #tpu.dot_dimension_numbers<[1], [0], [0], [1], [0, 0, 1, 1], [], []>} : vector<8x8xf32>, vector<8x512xf32>, vector<8x512xf32> -> vector<8x512xf32>
    %13 = vector.broadcast %6 : vector<8x1xf32> to vector<8x512xf32>
    %14 = arith.addf %12, %13 : vector<8x512xf32>
    %cst_5 = arith.constant 0.000000e+00 : f32
    %15 = vector.broadcast %cst_5 : f32 to vector<8x512xf32>
    %16 = arith.maximumf %14, %15 : vector<8x512xf32>
    %17 = vector.broadcast %7 : vector<8x1xf32> to vector<8x512xf32>
    %18 = arith.mulf %16, %17 : vector<8x512xf32>
    %19 = vector.broadcast %8 : vector<8x1xf32> to vector<8x512xf32>
    %20 = arith.addf %18, %19 : vector<8x512xf32>
    %21 = vector.extract_strided_slice %5 {offsets = [0, 4], sizes = [8, 1], strides = [1, 1]} : vector<8x16xf32> to vector<8x1xf32>
    %22 = vector.broadcast %21 : vector<8x1xf32> to vector<8x512xf32>
    %23 = arith.mulf %22, %20 : vector<8x512xf32>
    %24 = vector.extract_strided_slice %5 {offsets = [0, 0], sizes = [8, 1], strides = [1, 1]} : vector<8x16xf32> to vector<8x1xf32>
    %c17_i32 = arith.constant 17 : i32
    %25 = tpu.dynamic_rotate %20 by %c17_i32 dim 1 : vector<8x512xf32>, i32 -> vector<8x512xf32>
    %c16_i32 = arith.constant 16 : i32
    %26 = vector.broadcast %c16_i32 : i32 to vector<1x512xi32>
    %27 = arith.cmpi sge, %2, %26 : vector<1x512xi32>
    %c1_i32 = arith.constant 1 : i32
    %28 = vector.broadcast %c1_i32 : i32 to vector<1x512xi32>
    %29 = arith.cmpi sge, %4, %28 : vector<1x512xi32>
    %30 = arith.andi %27, %29 : vector<1x512xi1>
    %cst_6 = arith.constant 0.000000e+00 : f32
    %31 = vector.shape_cast %30 : vector<1x512xi1> to vector<1x512xi1>
    %32 = vector.broadcast %31 : vector<1x512xi1> to vector<8x512xi1>
    %33 = vector.broadcast %cst_6 : f32 to vector<8x512xf32>
    %34 = arith.select %32, %25, %33 : vector<8x512xi1>, vector<8x512xf32>
    %35 = vector.broadcast %24 : vector<8x1xf32> to vector<8x512xf32>
    %36 = arith.mulf %35, %34 : vector<8x512xf32>
    %37 = arith.addf %23, %36 : vector<8x512xf32>
    %38 = vector.extract_strided_slice %5 {offsets = [0, 1], sizes = [8, 1], strides = [1, 1]} : vector<8x16xf32> to vector<8x1xf32>
    %c16_i32_7 = arith.constant 16 : i32
    %39 = tpu.dynamic_rotate %20 by %c16_i32_7 dim 1 : vector<8x512xf32>, i32 -> vector<8x512xf32>
    %c16_i32_8 = arith.constant 16 : i32
    %40 = vector.broadcast %c16_i32_8 : i32 to vector<1x512xi32>
    %41 = arith.cmpi sge, %2, %40 : vector<1x512xi32>
    %cst_9 = arith.constant 0.000000e+00 : f32
    %42 = vector.shape_cast %41 : vector<1x512xi1> to vector<1x512xi1>
    %43 = vector.broadcast %42 : vector<1x512xi1> to vector<8x512xi1>
    %44 = vector.broadcast %cst_9 : f32 to vector<8x512xf32>
    %45 = arith.select %43, %39, %44 : vector<8x512xi1>, vector<8x512xf32>
    %46 = vector.broadcast %38 : vector<8x1xf32> to vector<8x512xf32>
    %47 = arith.mulf %46, %45 : vector<8x512xf32>
    %48 = arith.addf %37, %47 : vector<8x512xf32>
    %49 = vector.extract_strided_slice %5 {offsets = [0, 2], sizes = [8, 1], strides = [1, 1]} : vector<8x16xf32> to vector<8x1xf32>
    %c15_i32_10 = arith.constant 15 : i32
    %50 = tpu.dynamic_rotate %20 by %c15_i32_10 dim 1 : vector<8x512xf32>, i32 -> vector<8x512xf32>
    %c16_i32_11 = arith.constant 16 : i32
    %51 = vector.broadcast %c16_i32_11 : i32 to vector<1x512xi32>
    %52 = arith.cmpi sge, %2, %51 : vector<1x512xi32>
    %c15_i32_12 = arith.constant 15 : i32
    %53 = vector.broadcast %c15_i32_12 : i32 to vector<1x512xi32>
    %54 = arith.cmpi slt, %4, %53 : vector<1x512xi32>
    %55 = arith.andi %52, %54 : vector<1x512xi1>
    %cst_13 = arith.constant 0.000000e+00 : f32
    %56 = vector.shape_cast %55 : vector<1x512xi1> to vector<1x512xi1>
    %57 = vector.broadcast %56 : vector<1x512xi1> to vector<8x512xi1>
    %58 = vector.broadcast %cst_13 : f32 to vector<8x512xf32>
    %59 = arith.select %57, %50, %58 : vector<8x512xi1>, vector<8x512xf32>
    %60 = vector.broadcast %49 : vector<8x1xf32> to vector<8x512xf32>
    %61 = arith.mulf %60, %59 : vector<8x512xf32>
    %62 = arith.addf %48, %61 : vector<8x512xf32>
    %63 = vector.extract_strided_slice %5 {offsets = [0, 3], sizes = [8, 1], strides = [1, 1]} : vector<8x16xf32> to vector<8x1xf32>
    %c1_i32_14 = arith.constant 1 : i32
    %64 = tpu.dynamic_rotate %20 by %c1_i32_14 dim 1 : vector<8x512xf32>, i32 -> vector<8x512xf32>
    %c1_i32_15 = arith.constant 1 : i32
    %65 = vector.broadcast %c1_i32_15 : i32 to vector<1x512xi32>
    %66 = arith.cmpi sge, %4, %65 : vector<1x512xi32>
    %cst_16 = arith.constant 0.000000e+00 : f32
    %67 = vector.shape_cast %66 : vector<1x512xi1> to vector<1x512xi1>
    %68 = vector.broadcast %67 : vector<1x512xi1> to vector<8x512xi1>
    %69 = vector.broadcast %cst_16 : f32 to vector<8x512xf32>
    %70 = arith.select %68, %64, %69 : vector<8x512xi1>, vector<8x512xf32>
    %71 = vector.broadcast %63 : vector<8x1xf32> to vector<8x512xf32>
    %72 = arith.mulf %71, %70 : vector<8x512xf32>
    %73 = arith.addf %62, %72 : vector<8x512xf32>
    %74 = vector.extract_strided_slice %5 {offsets = [0, 5], sizes = [8, 1], strides = [1, 1]} : vector<8x16xf32> to vector<8x1xf32>
    %c511_i32 = arith.constant 511 : i32
    %75 = tpu.dynamic_rotate %20 by %c511_i32 dim 1 : vector<8x512xf32>, i32 -> vector<8x512xf32>
    %c15_i32_17 = arith.constant 15 : i32
    %76 = vector.broadcast %c15_i32_17 : i32 to vector<1x512xi32>
    %77 = arith.cmpi slt, %4, %76 : vector<1x512xi32>
    %cst_18 = arith.constant 0.000000e+00 : f32
    %78 = vector.shape_cast %77 : vector<1x512xi1> to vector<1x512xi1>
    %79 = vector.broadcast %78 : vector<1x512xi1> to vector<8x512xi1>
    %80 = vector.broadcast %cst_18 : f32 to vector<8x512xf32>
    %81 = arith.select %79, %75, %80 : vector<8x512xi1>, vector<8x512xf32>
    %82 = vector.broadcast %74 : vector<8x1xf32> to vector<8x512xf32>
    %83 = arith.mulf %82, %81 : vector<8x512xf32>
    %84 = arith.addf %73, %83 : vector<8x512xf32>
    %85 = vector.extract_strided_slice %5 {offsets = [0, 6], sizes = [8, 1], strides = [1, 1]} : vector<8x16xf32> to vector<8x1xf32>
    %c497_i32 = arith.constant 497 : i32
    %86 = tpu.dynamic_rotate %20 by %c497_i32 dim 1 : vector<8x512xf32>, i32 -> vector<8x512xf32>
    %c240_i32 = arith.constant 240 : i32
    %87 = vector.broadcast %c240_i32 : i32 to vector<1x512xi32>
    %88 = arith.cmpi slt, %2, %87 : vector<1x512xi32>
    %c1_i32_19 = arith.constant 1 : i32
    %89 = vector.broadcast %c1_i32_19 : i32 to vector<1x512xi32>
    %90 = arith.cmpi sge, %4, %89 : vector<1x512xi32>
    %91 = arith.andi %88, %90 : vector<1x512xi1>
    %cst_20 = arith.constant 0.000000e+00 : f32
    %92 = vector.shape_cast %91 : vector<1x512xi1> to vector<1x512xi1>
    %93 = vector.broadcast %92 : vector<1x512xi1> to vector<8x512xi1>
    %94 = vector.broadcast %cst_20 : f32 to vector<8x512xf32>
    %95 = arith.select %93, %86, %94 : vector<8x512xi1>, vector<8x512xf32>
    %96 = vector.broadcast %85 : vector<8x1xf32> to vector<8x512xf32>
    %97 = arith.mulf %96, %95 : vector<8x512xf32>
    %98 = arith.addf %84, %97 : vector<8x512xf32>
    %99 = vector.extract_strided_slice %5 {offsets = [0, 7], sizes = [8, 1], strides = [1, 1]} : vector<8x16xf32> to vector<8x1xf32>
    %c496_i32 = arith.constant 496 : i32
    %100 = tpu.dynamic_rotate %20 by %c496_i32 dim 1 : vector<8x512xf32>, i32 -> vector<8x512xf32>
    %c240_i32_21 = arith.constant 240 : i32
    %101 = vector.broadcast %c240_i32_21 : i32 to vector<1x512xi32>
    %102 = arith.cmpi slt, %2, %101 : vector<1x512xi32>
    %cst_22 = arith.constant 0.000000e+00 : f32
    %103 = vector.shape_cast %102 : vector<1x512xi1> to vector<1x512xi1>
    %104 = vector.broadcast %103 : vector<1x512xi1> to vector<8x512xi1>
    %105 = vector.broadcast %cst_22 : f32 to vector<8x512xf32>
    %106 = arith.select %104, %100, %105 : vector<8x512xi1>, vector<8x512xf32>
    %107 = vector.broadcast %99 : vector<8x1xf32> to vector<8x512xf32>
    %108 = arith.mulf %107, %106 : vector<8x512xf32>
    %109 = arith.addf %98, %108 : vector<8x512xf32>
    %110 = vector.extract_strided_slice %5 {offsets = [0, 8], sizes = [8, 1], strides = [1, 1]} : vector<8x16xf32> to vector<8x1xf32>
    %c495_i32 = arith.constant 495 : i32
    %111 = tpu.dynamic_rotate %20 by %c495_i32 dim 1 : vector<8x512xf32>, i32 -> vector<8x512xf32>
    %c240_i32_23 = arith.constant 240 : i32
    %112 = vector.broadcast %c240_i32_23 : i32 to vector<1x512xi32>
    %113 = arith.cmpi slt, %2, %112 : vector<1x512xi32>
    %c15_i32_24 = arith.constant 15 : i32
    %114 = vector.broadcast %c15_i32_24 : i32 to vector<1x512xi32>
    %115 = arith.cmpi slt, %4, %114 : vector<1x512xi32>
    %116 = arith.andi %113, %115 : vector<1x512xi1>
    %cst_25 = arith.constant 0.000000e+00 : f32
    %117 = vector.shape_cast %116 : vector<1x512xi1> to vector<1x512xi1>
    %118 = vector.broadcast %117 : vector<1x512xi1> to vector<8x512xi1>
    %119 = vector.broadcast %cst_25 : f32 to vector<8x512xf32>
    %120 = arith.select %118, %111, %119 : vector<8x512xi1>, vector<8x512xf32>
    %121 = vector.broadcast %110 : vector<8x1xf32> to vector<8x512xf32>
    %122 = arith.mulf %121, %120 : vector<8x512xf32>
    %123 = arith.addf %109, %122 : vector<8x512xf32>
    %124 = vector.broadcast %8 : vector<8x1xf32> to vector<8x512xf32>
    %125 = arith.addf %123, %124 : vector<8x512xf32>
    %cst_26 = arith.constant 0.000000e+00 : f32
    %126 = vector.broadcast %cst_26 : f32 to vector<8x512xf32>
    %127 = arith.maximumf %125, %126 : vector<8x512xf32>
    %c17_i32_27 = arith.constant 17 : i32
    %128 = tpu.dynamic_rotate %127 by %c17_i32_27 dim 1 : vector<8x512xf32>, i32 -> vector<8x512xf32>
    %c16_i32_28 = arith.constant 16 : i32
    %129 = vector.broadcast %c16_i32_28 : i32 to vector<1x512xi32>
    %130 = arith.cmpi sge, %2, %129 : vector<1x512xi32>
    %c1_i32_29 = arith.constant 1 : i32
    %131 = vector.broadcast %c1_i32_29 : i32 to vector<1x512xi32>
    %132 = arith.cmpi sge, %4, %131 : vector<1x512xi32>
    %133 = arith.andi %130, %132 : vector<1x512xi1>
    %cst_30 = arith.constant 0.000000e+00 : f32
    %134 = vector.shape_cast %133 : vector<1x512xi1> to vector<1x512xi1>
    %135 = vector.broadcast %134 : vector<1x512xi1> to vector<8x512xi1>
    %136 = vector.broadcast %cst_30 : f32 to vector<8x512xf32>
    %137 = arith.select %135, %128, %136 : vector<8x512xi1>, vector<8x512xf32>
    %c16_i32_31 = arith.constant 16 : i32
    %138 = tpu.dynamic_rotate %127 by %c16_i32_31 dim 1 : vector<8x512xf32>, i32 -> vector<8x512xf32>
    %c16_i32_32 = arith.constant 16 : i32
    %139 = vector.broadcast %c16_i32_32 : i32 to vector<1x512xi32>
    %140 = arith.cmpi sge, %2, %139 : vector<1x512xi32>
    %cst_33 = arith.constant 0.000000e+00 : f32
    %141 = vector.shape_cast %140 : vector<1x512xi1> to vector<1x512xi1>
    %142 = vector.broadcast %141 : vector<1x512xi1> to vector<8x512xi1>
    %143 = vector.broadcast %cst_33 : f32 to vector<8x512xf32>
    %144 = arith.select %142, %138, %143 : vector<8x512xi1>, vector<8x512xf32>
    %c15_i32_34 = arith.constant 15 : i32
    %145 = tpu.dynamic_rotate %127 by %c15_i32_34 dim 1 : vector<8x512xf32>, i32 -> vector<8x512xf32>
    %c16_i32_35 = arith.constant 16 : i32
    %146 = vector.broadcast %c16_i32_35 : i32 to vector<1x512xi32>
    %147 = arith.cmpi sge, %2, %146 : vector<1x512xi32>
    %c15_i32_36 = arith.constant 15 : i32
    %148 = vector.broadcast %c15_i32_36 : i32 to vector<1x512xi32>
    %149 = arith.cmpi slt, %4, %148 : vector<1x512xi32>
    %150 = arith.andi %147, %149 : vector<1x512xi1>
    %cst_37 = arith.constant 0.000000e+00 : f32
    %151 = vector.shape_cast %150 : vector<1x512xi1> to vector<1x512xi1>
    %152 = vector.broadcast %151 : vector<1x512xi1> to vector<8x512xi1>
    %153 = vector.broadcast %cst_37 : f32 to vector<8x512xf32>
    %154 = arith.select %152, %145, %153 : vector<8x512xi1>, vector<8x512xf32>
    %c1_i32_38 = arith.constant 1 : i32
    %155 = tpu.dynamic_rotate %127 by %c1_i32_38 dim 1 : vector<8x512xf32>, i32 -> vector<8x512xf32>
    %c1_i32_39 = arith.constant 1 : i32
    %156 = vector.broadcast %c1_i32_39 : i32 to vector<1x512xi32>
    %157 = arith.cmpi sge, %4, %156 : vector<1x512xi32>
    %cst_40 = arith.constant 0.000000e+00 : f32
    %158 = vector.shape_cast %157 : vector<1x512xi1> to vector<1x512xi1>
    %159 = vector.broadcast %158 : vector<1x512xi1> to vector<8x512xi1>
    %160 = vector.broadcast %cst_40 : f32 to vector<8x512xf32>
    %161 = arith.select %159, %155, %160 : vector<8x512xi1>, vector<8x512xf32>
    %c511_i32_41 = arith.constant 511 : i32
    %162 = tpu.dynamic_rotate %127 by %c511_i32_41 dim 1 : vector<8x512xf32>, i32 -> vector<8x512xf32>
    %c15_i32_42 = arith.constant 15 : i32
    %163 = vector.broadcast %c15_i32_42 : i32 to vector<1x512xi32>
    %164 = arith.cmpi slt, %4, %163 : vector<1x512xi32>
    %cst_43 = arith.constant 0.000000e+00 : f32
    %165 = vector.shape_cast %164 : vector<1x512xi1> to vector<1x512xi1>
    %166 = vector.broadcast %165 : vector<1x512xi1> to vector<8x512xi1>
    %167 = vector.broadcast %cst_43 : f32 to vector<8x512xf32>
    %168 = arith.select %166, %162, %167 : vector<8x512xi1>, vector<8x512xf32>
    %c497_i32_44 = arith.constant 497 : i32
    %169 = tpu.dynamic_rotate %127 by %c497_i32_44 dim 1 : vector<8x512xf32>, i32 -> vector<8x512xf32>
    %c240_i32_45 = arith.constant 240 : i32
    %170 = vector.broadcast %c240_i32_45 : i32 to vector<1x512xi32>
    %171 = arith.cmpi slt, %2, %170 : vector<1x512xi32>
    %c1_i32_46 = arith.constant 1 : i32
    %172 = vector.broadcast %c1_i32_46 : i32 to vector<1x512xi32>
    %173 = arith.cmpi sge, %4, %172 : vector<1x512xi32>
    %174 = arith.andi %171, %173 : vector<1x512xi1>
    %cst_47 = arith.constant 0.000000e+00 : f32
    %175 = vector.shape_cast %174 : vector<1x512xi1> to vector<1x512xi1>
    %176 = vector.broadcast %175 : vector<1x512xi1> to vector<8x512xi1>
    %177 = vector.broadcast %cst_47 : f32 to vector<8x512xf32>
    %178 = arith.select %176, %169, %177 : vector<8x512xi1>, vector<8x512xf32>
    %c496_i32_48 = arith.constant 496 : i32
    %179 = tpu.dynamic_rotate %127 by %c496_i32_48 dim 1 : vector<8x512xf32>, i32 -> vector<8x512xf32>
    %c240_i32_49 = arith.constant 240 : i32
    %180 = vector.broadcast %c240_i32_49 : i32 to vector<1x512xi32>
    %181 = arith.cmpi slt, %2, %180 : vector<1x512xi32>
    %cst_50 = arith.constant 0.000000e+00 : f32
    %182 = vector.shape_cast %181 : vector<1x512xi1> to vector<1x512xi1>
    %183 = vector.broadcast %182 : vector<1x512xi1> to vector<8x512xi1>
    %184 = vector.broadcast %cst_50 : f32 to vector<8x512xf32>
    %185 = arith.select %183, %179, %184 : vector<8x512xi1>, vector<8x512xf32>
    %c495_i32_51 = arith.constant 495 : i32
    %186 = tpu.dynamic_rotate %127 by %c495_i32_51 dim 1 : vector<8x512xf32>, i32 -> vector<8x512xf32>
    %c240_i32_52 = arith.constant 240 : i32
    %187 = vector.broadcast %c240_i32_52 : i32 to vector<1x512xi32>
    %188 = arith.cmpi slt, %2, %187 : vector<1x512xi32>
    %c15_i32_53 = arith.constant 15 : i32
    %189 = vector.broadcast %c15_i32_53 : i32 to vector<1x512xi32>
    %190 = arith.cmpi slt, %4, %189 : vector<1x512xi32>
    %191 = arith.andi %188, %190 : vector<1x512xi1>
    %cst_54 = arith.constant 0.000000e+00 : f32
    %192 = vector.shape_cast %191 : vector<1x512xi1> to vector<1x512xi1>
    %193 = vector.broadcast %192 : vector<1x512xi1> to vector<8x512xi1>
    %194 = vector.broadcast %cst_54 : f32 to vector<8x512xf32>
    %195 = arith.select %193, %186, %194 : vector<8x512xi1>, vector<8x512xf32>
    %196 = tpu.concatenate %137, %144, %154, %161, %127, %168, %178, %185, %195 in 0 : vector<8x512xf32>, vector<8x512xf32>, vector<8x512xf32>, vector<8x512xf32>, vector<8x512xf32>, vector<8x512xf32>, vector<8x512xf32>, vector<8x512xf32>, vector<8x512xf32> -> vector<72x512xf32>
    %c0_55 = arith.constant 0 : index
    %c0_56 = arith.constant 0 : index
    %197 = vector.load %arg4[%c0_55, %c0_56] : memref<8x72xf32, #tpu.memory_space<vmem>>, vector<8x72xf32>
    %cst_57 = arith.constant dense<0.000000e+00> : vector<8x512xf32>
    %198 = tpu.matmul %197, %196, %cst_57 {dimension_numbers = #tpu.dot_dimension_numbers<[1], [0], [0], [1], [0, 0, 1, 1], [], []>} : vector<8x72xf32>, vector<72x512xf32>, vector<8x512xf32> -> vector<8x512xf32>
    %199 = vector.broadcast %9 : vector<8x1xf32> to vector<8x512xf32>
    %200 = arith.addf %198, %199 : vector<8x512xf32>
    %cst_58 = arith.constant 0.000000e+00 : f32
    %201 = vector.broadcast %cst_58 : f32 to vector<8x512xf32>
    %202 = arith.maximumf %200, %201 : vector<8x512xf32>
    %c0_59 = arith.constant 0 : index
    %c0_60 = arith.constant 0 : index
    %203 = vector.load %arg5[%c0_59, %c0_60] : memref<8x512xf32, #tpu.memory_space<vmem>>, vector<8x512xf32>
    tpu.vector_store %arg5[%c0_59, %c0_60], %202 {strides = array<i32>} : memref<8x512xf32, #tpu.memory_space<vmem>>, vector<8x512xf32>,
    return
  }
  func.func @transform_0(%arg0: i32) -> (i32, i32) {
    %c0_i32 = arith.constant 0 : i32
    %c0_i32_0 = arith.constant 0 : i32
    return %c0_i32, %arg0 : i32, i32
  }
  func.func @transform_1(%arg0: i32) -> (i32, i32) {
    %c0_i32 = arith.constant 0 : i32
    %c0_i32_0 = arith.constant 0 : i32
    %c0_i32_1 = arith.constant 0 : i32
    return %c0_i32, %c0_i32_0 : i32, i32
  }
  func.func @transform_2(%arg0: i32) -> (i32, i32) {
    %c0_i32 = arith.constant 0 : i32
    %c0_i32_0 = arith.constant 0 : i32
    %c0_i32_1 = arith.constant 0 : i32
    return %c0_i32, %c0_i32_0 : i32, i32
  }
  func.func @transform_3(%arg0: i32) -> (i32, i32) {
    %c0_i32 = arith.constant 0 : i32
    %c0_i32_0 = arith.constant 0 : i32
    %c0_i32_1 = arith.constant 0 : i32
    return %c0_i32, %c0_i32_0 : i32, i32
  }
  func.func @transform_4(%arg0: i32) -> (i32, i32) {
    %c0_i32 = arith.constant 0 : i32
    %c0_i32_0 = arith.constant 0 : i32
    return %c0_i32, %arg0 : i32, i32
  }
}

</mosaic_0001>

<bundles_post_ra>
// kernel: idsc_forward.1
= control target key start
LH: loop header
LB: loop body
LE: loop exit
PB: predicated region body
PF: predicated region fallthrough
CT: control target
= control target key end

     0   :  { %vm41_vm0 = vcmask 64512   ;;  %v789_v3 = vmov 9   ;;  %v790_v4 = vmov 11   ;;  %v791_v8 = vmov 4   ;;  %s803_s27 = smov 1   ;;  %s804_s28 = smov 127   ;;  %s1618_s0 = inlined_call_operand.vmem [shape: f32[8,512], index: 0, kind: input, shape index: {}]   ;;  %s1619_s1 = inlined_call_operand.vmem [shape: f32[8,8], index: 1, kind: input, shape index: {}]   ;;  %s1620_s2 = inlined_call_operand.vmem [shape: f32[8,16], index: 2, kind: input, shape index: {}]   ;;  %s1621_s3 = inlined_call_operand.vmem [shape: f32[8,72], index: 3, kind: input, shape index: {}]   ;;  %s1622_s4 = inlined_call_operand.vmem [shape: f32[8,512], index: 4, kind: output, shape index: {}]  }
   0x1   :  { %v31_v0 = vld [vmem:[%s1618_s0] sm:$0xff]  ;;  %v32_v1 = vld [vmem:[%s1618_s0 + $0x8] sm:$0xff]  ;;  %v33_v2 = vld [vmem:[%s1618_s0 + $0x10] sm:$0xff]  ;;  %775 = vset.pattern.permute.xlu0 %v789_v3  ;;  %777 = vset.pattern.permute.xlu1 %v790_v4  ;;  %v792_v9 = vmov 10   ;;  %v793_v10 = vmov 0   ;;  %v794_v11 = vmov 1   ;;  %v17_v43 = vlaneseq }
   0x2   :  { %60 = vmatpush.msra.mxu0 %v31_v0  ;;  %80 = vmatpush.msra.mxu1 %v32_v1  ;;  %v34_v5 = vld [vmem:[%s1618_s0 + $0x18] sm:$0xff]  ;;  %v35_v6 = vld [vmem:[%s1619_s1] sm:$0xff]  ;;  %v795_v13 = vmov 2   ;;  %v796_v18 = vmov 3   ;;  %s797_s0 = smov 17   ;;  %v798_v27 = vmov 5  }
   0x3   :  { %100 = vmatpush.msra.mxu2 %v33_v2  ;;  %120 = vmatpush.msra.mxu3 %v34_v5  ;;  %v853_v7 = vld [vmem:[%s1620_s2] sm:$0xff]  ;;  %s799_s1 = smov 16   ;;  %v800_v28 = vmov 6   ;;  %s801_s2 = smov 15   ;;  %v802_v29 = vmov 7   ;;  %v805_v30 = vmov 8  }
   0x4   :  { %718 = vmatmul.msk.f32.vlgmr.msra.gmra.mxu0 %vm41_vm0, %v35_v6  ;;  %719 = vmatmul.msk.f32.vlgmr.msra.gmra.mxu1 %vm41_vm0, %v35_v6  ;;  %s806_s29 = smov 113   ;;  %s807_s30 = smov 111   ;;  %v937_v45 = vand.u32 127, %v17_v43 }
   0x5   :  { %720 = vmatmul.msk.f32.vlgmr.msra.gmra.mxu2 %vm41_vm0, %v35_v6  ;;  %721 = vmatmul.msk.f32.vlgmr.msra.gmra.mxu3 %vm41_vm0, %v35_v6  ;;  %s808_s5 = smov 112  }
   0x6   :  { %38 = vperm.xlu0 %775, %v853_v7   ;;  %138 = vperm.xlu1 %777, %v853_v7   ;;  %v944_v46 = vadd.s32 128, %v937_v45  ;;  %vm1624_vm1 = vcmp.lt.s32.totalorder %v937_v45, 17  ;;  %vm1628_vm3 = vcmp.lt.s32.totalorder %v937_v45, 16  ;;  %vm1627_vm4 = vcmp.lt.s32.totalorder %v937_v45, 15 }
   0x7   :  { %778 = vset.pattern.permute.xlu2 %v791_v8  ;;  %v1001_v8 = vadd.s32 256, %v937_v45  ;;  %vm1629_vm6 = vcmp.lt.s32.totalorder %v937_v45, 1  ;;  %vm1634_vm10 = vcmp.lt.s32.totalorder %v937_v45, 112  ;;  %v26_v43 = vand.u32 15, %v937_v45 }
   0x8   :  { %146 = vperm.xlu2 %778, %v853_v7   ;;  %v27_v49 = vand.u32 15, %v944_v46 }
   0x9   :  { %vm1079_vm12 = vcmp.ge.s32.totalorder %v26_v43, 1  ;;  %vm1094_vm15 = vcmp.lt.s32.totalorder %v26_v43, 15 }
   0xa   :  { %vm956_vm2 = vcmp.ge.s32.totalorder %v27_v49, 1  ;;  %vm988_vm5 = vcmp.lt.s32.totalorder %v27_v49, 15 }
   0xe   :  { %776 = vset.pattern.permute.xlu0 %v792_v9 }
   0xf   :  { %130 = vperm.xlu0 %776, %v853_v7  }
  0x17   :  { %779 = vset.pattern.permute.xlu0 %v793_v10 }
  0x18   :  { %191 = vperm.xlu0 %779, %v853_v7  }
  0x20   :  { %780 = vset.pattern.permute.xlu0 %v794_v11 }
  0x21   :  { %228 = vperm.xlu0 %780, %v853_v7  }
  0x29   :  { %781 = vset.pattern.permute.xlu0 %v795_v13  ;;  %v24_v13 = vand.u32 255, %v1001_v8 }
  0x2a   :  { %273 = vperm.xlu0 %781, %v853_v7  }
  0x2b   :  { %vm1016_vm7 = vcmp.ge.s32.totalorder %v24_v13, 16 }
  0x32   :  { %782 = vset.pattern.permute.xlu0 %v796_v18 }
  0x33   :  { %310 = vperm.xlu0 %782, %v853_v7  }
  0x3b   :  { %783 = vset.pattern.permute.xlu0 %v798_v27 }
  0x3c   :  { %347 = vperm.xlu0 %783, %v853_v7  }
  0x44   :  { %784 = vset.pattern.permute.xlu0 %v800_v28 }
  0x45   :  { %392 = vperm.xlu0 %784, %v853_v7  }
  0x4d   :  { %785 = vset.pattern.permute.xlu0 %v802_v29 }
  0x4e   :  { %429 = vperm.xlu0 %785, %v853_v7  }
  0x56   :  { %786 = vset.pattern.permute.xlu0 %v805_v30 }
  0x57   :  { %470 = vperm.xlu0 %786, %v853_v7  }
  0x62   :  { %v925_v41 = vpop.permute.xlu2 %146 }
  0x78   :  { %v39_v12 = vpop.permute.xlu0 %38  ;;  %v863_v22 = vpop.permute.xlu1 %138 }
  0x81   :  { %v62_v14 = vpop.f32.mrf.mxu0  ;;  %v82_v15 = vpop.f32.mrf.mxu1 }
  0x82   :  { %v63_v16 = vadd.f32 %v62_v14, %v39_v12  ;;  %v83_v17 = vadd.f32 %v82_v15, %v39_v12  ;;  %v131_v19 = vpop.permute.xlu0 %130  ;;  %v28_v14 = vand.u32 15, %v1001_v8 }
  0x84   :  { %v125_v20 = vmax.f32 %v63_v16, 0.0  ;;  %v126_v21 = vmax.f32 %v83_v17, 0.0  ;;  %vm1022_vm8 = vcmp.ge.s32.totalorder %v28_v14, 1 }
  0x85   :  { %vm1623_vm9 = vmand %vm1016_vm7, %vm1022_vm8 }
  0x86   :  { %v133_v23 = vmul.f32 %v131_v19, %v125_v20  ;;  %v134_v24 = vmul.f32 %v131_v19, %v126_v21 }
  0x88   :  { %v866_v25 = vadd.f32 %v863_v22, %v133_v23  ;;  %v869_v26 = vadd.f32 %v863_v22, %v134_v24  ;;  %v102_v31 = vpop.f32.mrf.mxu2  ;;  %v122_v34 = vpop.f32.mrf.mxu3 }
  0x89   :  { %v103_v32 = vadd.f32 %v102_v31, %v39_v12  ;;  %v123_v36 = vadd.f32 %v122_v34, %v39_v12 }
  0x8a   :  { %155 = vrot.lane.b32.xlu2 %v869_v26, %s797_s0  ;;  %153 = vrot.lane.b32.xlu1 %v866_v25, %s797_s0  ;;  %v948_v48 = vpop.permute.xlu0 %191  ;;  %v150_v55 = vmul.f32 %v925_v41, %v869_v26  ;;  %v149_v13 = vmul.f32 %v925_v41, %v866_v25 }
  0x8b   :  { %v127_v33 = vmax.f32 %v103_v32, 0.0  ;;  %v128_v38 = vmax.f32 %v123_v36, 0.0 }
  0x8d   :  { %v135_v35 = vmul.f32 %v131_v19, %v127_v33  ;;  %v136_v39 = vmul.f32 %v131_v19, %v128_v38 }
  0x8f   :  { %v904_v37 = vadd.f32 %v863_v22, %v135_v35  ;;  %v911_v40 = vadd.f32 %v863_v22, %v136_v39  ;;  %v1068_v39 = vadd.s32 384, %v937_v45 }
  0x92   :  { %204 = vrot.lane.b32.xlu2 %v869_v26, %s799_s1  ;;  %202 = vrot.lane.b32.xlu1 %v866_v25, %s799_s1 }
  0x93   :  { %v972_v57 = vpop.permute.xlu0 %228 }
  0x9a   :  { %241 = vrot.lane.b32.xlu2 %v869_v26, %s801_s2  ;;  %239 = vrot.lane.b32.xlu1 %v866_v25, %s801_s2 }
  0x9c   :  { %v985_v0 = vpop.permute.xlu0 %273 }
  0xa2   :  { %286 = vrot.lane.b32.xlu2 %v869_v26, %s803_s27  ;;  %284 = vrot.lane.b32.xlu1 %v866_v25, %s803_s27 }
  0xa5   :  { %v1004_v10 = vpop.permute.xlu0 %310 }
  0xaa   :  { %323 = vrot.lane.b32.xlu2 %v869_v26, %s804_s28  ;;  %321 = vrot.lane.b32.xlu1 %v866_v25, %s804_s28 }
  0xae   :  { %v1061_v35 = vpop.permute.xlu0 %347 }
  0xb2   :  { %360 = vrot.lane.b32.xlu2 %v869_v26, %s806_s29  ;;  %358 = vrot.lane.b32.xlu1 %v866_v25, %s806_s29 }
  0xb7   :  { %v1072_v49 = vpop.permute.xlu0 %392 }
  0xba   :  { %442 = vrot.lane.b32.xlu2 %v869_v26, %s807_s30  ;;  %403 = vrot.lane.b32.xlu1 %v866_v25, %s808_s5 }
  0xc2   :  { %157 = vrot.lane.b32.xlu2 %v904_v37, %s797_s0  ;;  %405 = vrot.lane.b32.xlu1 %v869_v26, %s808_s5 }
  0xca   :  { %208 = vrot.lane.b32.xlu2 %v911_v40, %s799_s1  ;;  %440 = vrot.lane.b32.xlu1 %v866_v25, %s807_s30 }
  0xd2   :  { %245 = vrot.lane.b32.xlu2 %v911_v40, %s801_s2  ;;  %159 = vrot.lane.b32.xlu1 %v911_v40, %s797_s0 }
  0xda   :  { %290 = vrot.lane.b32.xlu2 %v911_v40, %s803_s27  ;;  %206 = vrot.lane.b32.xlu1 %v904_v37, %s799_s1 }
  0xe2   :  { %327 = vrot.lane.b32.xlu2 %v911_v40, %s804_s28  ;;  %243 = vrot.lane.b32.xlu1 %v904_v37, %s801_s2 }
  0xe4   :  { %v156_v42 = vpop.permute.xlu2 %155 }
  0xea   :  { %364 = vrot.lane.b32.xlu2 %v911_v40, %s806_s29  ;;  %288 = vrot.lane.b32.xlu1 %v904_v37, %s803_s27 }
  0xec   :  { %v935_v44 = vpop.permute.xlu2 %204 }
  0xf2   :  { %409 = vrot.lane.b32.xlu2 %v911_v40, %s808_s5  ;;  %325 = vrot.lane.b32.xlu1 %v904_v37, %s804_s28 }
  0xf4   :  { %v946_v47 = vpop.permute.xlu2 %241 }
  0xfa   :  { %407 = vrot.lane.b32.xlu2 %v904_v37, %s808_s5  ;;  %362 = vrot.lane.b32.xlu1 %v904_v37, %s806_s29 }
  0xfc   :  { %v960_v51 = vpop.permute.xlu2 %286  ;;  %v962_v52 = vpop.permute.xlu1 %153 }
  0xfd   :  { %v164_v53 = vsel %vm1624_vm1, %v962_v52, %v156_v42 }
  0xfe   :  { %v187_v54 = vsel %vm956_vm2, %v164_v53, 0.0  ;;  %v29_v53 = vand.u32 15, %v1068_v39 }
  0xff   :  { %v195_v56 = vmul.f32 %v948_v48, %v187_v54  ;;  %v1648_v54 = vmov 0 }
 0x100   :  { %vm1086_vm13 = vcmp.ge.s32.totalorder %v29_v53, 1 }
 0x101   :  { %v199_v58 = vadd.f32 %v195_v56, %v150_v55 }
 0x102   :  { %446 = vrot.lane.b32.xlu2 %v911_v40, %s807_s30  ;;  %444 = vrot.lane.b32.xlu1 %v904_v37, %s807_s30 }
 0x104   :  { %v979_v59 = vpop.permute.xlu2 %323  ;;  %v203_v60 = vpop.permute.xlu1 %202 }
 0x105   :  { %v213_v61 = vsel %vm1628_vm3, %v203_v60, %v935_v44 }
 0x106   :  { %v232_v62 = vmul.f32 %v972_v57, %v213_v61 }
 0x108   :  { %v236_v63 = vadd.f32 %v232_v62, %v199_v58 }
 0x10c   :  { %v992_v2 = vpop.permute.xlu2 %360  ;;  %v240_v3 = vpop.permute.xlu1 %239 }
 0x10d   :  { %v250_v4 = vsel %vm1627_vm4, %v240_v3, %v946_v47 }
 0x10e   :  { %v269_v5 = vsel %vm988_vm5, %v250_v4, 0.0 }
 0x10f   :  { %v277_v6 = vmul.f32 %v985_v0, %v269_v5 }
 0x111   :  { %v281_v9 = vadd.f32 %v277_v6, %v236_v63 }
 0x114   :  { %v1006_v11 = vpop.permute.xlu2 %442  ;;  %v285_v12 = vpop.permute.xlu1 %284 }
 0x115   :  { %v295_v15 = vsel %vm1629_vm6, %v285_v12, %v960_v51 }
 0x116   :  { %v306_v16 = vsel %vm956_vm2, %v295_v15, 0.0 }
 0x117   :  { %v314_v17 = vmul.f32 %v1004_v10, %v306_v16 }
 0x119   :  { %v1026_v20 = vadd.f32 %v314_v17, %v281_v9 }
 0x11c   :  { %v158_v21 = vpop.permute.xlu2 %157  ;;  %v1032_v23 = vpop.permute.xlu1 %321 }
 0x11d   :  { %v163_v24 = vsel %vm1624_vm1, %v156_v42, %v158_v21  ;;  %v22_v42 = vand.u32 255, %v937_v45 }
 0x11e   :  { %v188_v26 = vsel %vm1623_vm9, %v163_v24, 0.0  ;;  %vm1635_vm9 = vcmp.lt.s32.totalorder %v937_v45, 127 }
 0x11f   :  { %v1042_v27 = vmul.f32 %v948_v48, %v188_v26  ;;  %vm1075_vm11 = vcmp.ge.s32.totalorder %v22_v42, 16  ;;  %v332_v25 = vsel %vm1635_vm9, %v1032_v23, %v979_v59 }
 0x120   :  { %v1649_v54 = vsel %vm1075_vm11, 4294967295, %v1648_v54  ;;  %vm1625_vm14 = vmand %vm1075_vm11, %vm1079_vm12 }
 0x121   :  { %vm1626_vm0 = vmand %vm1075_vm11, %vm1094_vm15 }
 0x124   :  { %v1044_v28 = vpop.permute.xlu2 %208  ;;  %v1046_v29 = vpop.permute.xlu1 %358 }
 0x125   :  { %v214_v56 = vsel %vm1628_vm3, %v1044_v28, %v203_v60 }
 0x126   :  { %v223_v6 = vsel %vm1075_vm11, %v214_v56, 0.0  ;;  %v342_v56 = vsel %vm1094_vm15, %v332_v25, 0.0 }
 0x12c   :  { %v1048_v30 = vpop.permute.xlu2 %245  ;;  %v1050_v31 = vpop.permute.xlu1 %403 }
 0x12d   :  { %v251_v60 = vsel %vm1627_vm4, %v1048_v30, %v240_v3 }
 0x12e   :  { %v268_v17 = vsel %vm1626_vm0, %v251_v60, 0.0  ;;  %vm1184_vm0 = vcmp.lt.s32.totalorder %v29_v53, 15 }
 0x12f   :  { %v276_v42 = vmul.f32 %v985_v0, %v268_v17 }
 0x134   :  { %v1053_v32 = vpop.permute.xlu2 %290  ;;  %v1055_v33 = vpop.permute.xlu1 %405 }
 0x135   :  { %v414_v34 = vsel %vm1634_vm10, %v1050_v31, %v1055_v33 }
 0x13c   :  { %v1063_v36 = vpop.permute.xlu2 %327  ;;  %v1065_v38 = vpop.permute.xlu1 %440 }
 0x144   :  { %v1098_v62 = vpop.permute.xlu2 %364  ;;  %v160_v63 = vpop.permute.xlu1 %159 }
 0x145   :  { %v162_v4 = vsel %vm1624_vm1, %v158_v21, %v160_v63  ;;  %v165_v5 = vsel %vm1624_vm1, %v160_v63, %v962_v52  ;;  %v296_v52 = vsel %vm1629_vm6, %v1053_v32, %v285_v12  ;;  %vm1632_vm1 = vcmp.lt.s32.totalorder %v937_v45, 113  ;;  %v1135_v21 = vpop.permute.xlu0 %429 }
 0x146   :  { %v186_v9 = vsel %vm1625_vm14, %v165_v5, 0.0  ;;  %v189_v3 = vsel %vm1086_vm13, %v162_v4, 0.0  ;;  %v231_v12 = vmul.f32 %v972_v57, %v223_v6  ;;  %v369_v26 = vsel %vm1632_vm1, %v1046_v29, %v992_v2 }
 0x147   :  { %v194_v15 = vmul.f32 %v948_v48, %v186_v9  ;;  %v197_v16 = vmul.f32 %v948_v48, %v189_v3  ;;  %v305_v48 = vsel %vm1079_vm12, %v296_v52, 0.0  ;;  %vm1636_vm14 = vcmp.lt.s32.totalorder %v937_v45, 111 }
 0x148   :  { %v313_v4 = vmul.f32 %v1004_v10, %v305_v48  ;;  %v387_v6 = vsel %vm1079_vm12, %v369_v26, 0.0  ;;  %v350_v9 = vmul.f32 %v1061_v35, %v342_v56  ;;  %v451_v3 = vsel %vm1636_vm14, %v1065_v38, %v1006_v11 }
 0x149   :  { %v198_v24 = vadd.f32 %v194_v15, %v149_v13  ;;  %v395_v52 = vmul.f32 %v1072_v49, %v387_v6  ;;  %v465_v17 = vsel %vm1094_vm15, %v451_v3, 0.0  ;;  %v152_v3 = vmul.f32 %v925_v41, %v911_v40 }
 0x14a   :  { %v370_v40 = vsel %vm1632_vm1, %v1098_v62, %v1046_v29 }
 0x14b   :  { %v235_v43 = vadd.f32 %v231_v12, %v198_v24  ;;  %v432_v12 = vmul.f32 %v1135_v21, %v414_v34  ;;  %v201_v53 = vadd.f32 %v197_v16, %v152_v3 }
 0x14c   :  { %v1152_v63 = vpop.permute.xlu2 %409  ;;  %v1154_v60 = vpop.permute.xlu1 %206 }
 0x14d   :  { %v280_v5 = vadd.f32 %v276_v42, %v235_v43  ;;  %v1167_v25 = vpop.permute.xlu0 %470  ;;  %v211_v34 = vsel %vm1628_vm3, %v1154_v60, %v1044_v28  ;;  %v333_v28 = vsel %vm1635_vm9, %v1063_v36, %v1032_v23 }
 0x14e   :  { %v473_v42 = vmul.f32 %v1167_v25, %v465_v17  ;;  %v345_v23 = vsel %vm1184_vm0, %v333_v28, 0.0 }
 0x14f   :  { %v317_v13 = vadd.f32 %v313_v4, %v280_v5  ;;  %v25_v4 = vand.u32 255, %v1068_v39 }
 0x151   :  { %v354_v15 = vadd.f32 %v350_v9, %v317_v13 }
 0x153   :  { %v399_v24 = vadd.f32 %v395_v52, %v354_v15 }
 0x154   :  { %v1170_v48 = vpop.permute.xlu2 %407  ;;  %v1172_v26 = vpop.permute.xlu1 %243 }
 0x155   :  { %v436_v43 = vadd.f32 %v432_v12, %v399_v24  ;;  %v248_v56 = vsel %vm1627_vm4, %v1172_v26, %v1048_v30  ;;  %v234_v30 = vmul.f32 %v972_v57, %v211_v34  ;;  %vm1195_vm4 = vcmp.lt.s32.totalorder %v25_v4, 240 }
 0x156   :  { %v271_v9 = vsel %vm1184_vm0, %v248_v56, 0.0  ;;  %vm1630_vm3 = vmand %vm1195_vm4, %vm1086_vm13  ;;  %v415_v24 = vsel %vm1634_vm10, %v1152_v63, %v1050_v31 }
 0x157   :  { %v1188_v6 = vadd.f32 %v473_v42, %v436_v43  ;;  %v279_v13 = vmul.f32 %v985_v0, %v271_v9  ;;  %v238_v15 = vadd.f32 %v234_v30, %v201_v53  ;;  %v353_v43 = vmul.f32 %v1061_v35, %v345_v23 }
 0x158   :  { %v427_v4 = vsel %vm1195_vm4, %v415_v24, 0.0 }
 0x159   :  { %v283_v42 = vadd.f32 %v279_v13, %v238_v15  ;;  %v435_v28 = vmul.f32 %v1135_v21, %v427_v4  ;;  %v23_v13 = vand.u32 255, %v944_v46 }
 0x15c   :  { %v289_v52 = vpop.permute.xlu1 %288  ;;  %v1217_v16 = vpop.permute.xlu2 %446 }
 0x15d   :  { %v293_v17 = vsel %vm1629_vm6, %v289_v52, %v1053_v32  ;;  %v390_v32 = vsel %vm1630_vm3, %v370_v40, 0.0  ;;  %vm1631_vm6 = vmand %vm1195_vm4, %vm1184_vm0  ;;  %v452_v31 = vsel %vm1636_vm14, %v1217_v16, %v1065_v38  ;;  %vm1256_vm3 = vcmp.lt.s32.totalorder %v23_v13, 240 }
 0x15e   :  { %v308_v12 = vsel %vm1086_vm13, %v293_v17, 0.0  ;;  %v398_v34 = vmul.f32 %v1072_v49, %v390_v32  ;;  %v468_v3 = vsel %vm1631_vm6, %v452_v31, 0.0  ;;  %vm1633_vm6 = vmand %vm1256_vm3, %vm956_vm2 }
 0x15f   :  { %v316_v29 = vmul.f32 %v1004_v10, %v308_v12  ;;  %v476_v38 = vmul.f32 %v1167_v25, %v468_v3 }
 0x161   :  { %v320_v56 = vadd.f32 %v316_v29, %v283_v42  ;;  %v413_v29 = vsel %vm1634_vm10, %v1055_v33, %v1170_v48  ;;  %vm1664_vm10 = vcmp.lt.s32.totalorder %v937_v45, 16 }
 0x162   :  { %v425_v31 = vsel %vm1256_vm3, %v413_v29, 0.0 }
 0x163   :  { %v357_v9 = vadd.f32 %v353_v43, %v320_v56  ;;  %v433_v4 = vmul.f32 %v1135_v21, %v425_v31 }
 0x164   :  { %v326_v30 = vpop.permute.xlu1 %325 }
 0x165   :  { %v402_v53 = vadd.f32 %v398_v34, %v357_v9  ;;  %v331_v15 = vsel %vm1635_vm9, %v979_v59, %v326_v30 }
 0x166   :  { %v343_v12 = vsel %vm988_vm5, %v331_v15, 0.0 }
 0x167   :  { %v439_v40 = vadd.f32 %v435_v28, %v402_v53  ;;  %v351_v24 = vmul.f32 %v1061_v35, %v343_v12 }
 0x169   :  { %v1254_v17 = vadd.f32 %v476_v38, %v439_v40  ;;  %v355_v43 = vadd.f32 %v351_v24, %v1026_v20  ;;  %v212_v20 = vsel %vm1664_vm10, %v935_v44, %v1154_v60  ;;  %vm1665_vm10 = vcmp.lt.s32.totalorder %v937_v45, 15 }
 0x16a   :  { %v249_v44 = vsel %vm1665_vm10, %v946_v47, %v1172_v26  ;;  %v151_v47 = vmul.f32 %v925_v41, %v904_v37  ;;  %vm1667_vm10 = vcmp.lt.s32.totalorder %v937_v45, 127 }
 0x16b   :  { %v330_v53 = vsel %vm1667_vm10, %v326_v30, %v1063_v36  ;;  %vm1669_vm10 = vcmp.lt.s32.totalorder %v937_v45, 111 }
 0x16c   :  { %v363_v46 = vpop.permute.xlu1 %362 }
 0x16d   :  { %v368_v59 = vsel %vm1632_vm1, %v992_v2, %v363_v46  ;;  %vm454_vm1 = vmand %vm1256_vm3, %vm988_vm5 }
 0x16e   :  { %v388_v42 = vsel %vm1633_vm6, %v368_v59, 0.0  ;;  %vm1289_vm6 = vcmp.lt.s32.totalorder %v28_v14, 15 }
 0x16f   :  { %v396_v32 = vmul.f32 %v1072_v49, %v388_v42  ;;  %vm1637_vm9 = vmand %vm1016_vm7, %vm1289_vm6  ;;  %v344_v41 = vsel %vm1289_vm6, %v330_v53, 0.0 }
 0x170   :  { %v270_v28 = vsel %vm1637_vm9, %v249_v44, 0.0 }
 0x171   :  { %v400_v56 = vadd.f32 %v396_v32, %v355_v43  ;;  %v278_v38 = vmul.f32 %v985_v0, %v270_v28 }
 0x173   :  { %v437_v14 = vadd.f32 %v433_v4, %v400_v56 }
 0x174   :  { %v445_v33 = vpop.permute.xlu1 %444 }
 0x175   :  { %v450_v34 = vsel %vm1636_vm14, %v1006_v11, %v445_v33  ;;  %v225_v11 = vsel %vm1016_vm7, %v212_v20, 0.0  ;;  %vm1666_vm14 = vcmp.lt.s32.totalorder %v937_v45, 1 }
 0x176   :  { %v466_v8 = vsel %vm454_vm1, %v450_v34, 0.0  ;;  %v294_v9 = vsel %vm1666_vm14, %v960_v51, %v289_v52  ;;  %v233_v26 = vmul.f32 %v972_v57, %v225_v11  ;;  %v200_v52 = vadd.f32 %v1042_v27, %v151_v47 }
 0x177   :  { %v474_v60 = vmul.f32 %v1167_v25, %v466_v8  ;;  %v307_v51 = vsel %vm1022_vm8, %v294_v9, 0.0  ;;  %vm1668_vm14 = vcmp.lt.s32.totalorder %v937_v45, 113 }
 0x178   :  { %v367_v40 = vsel %vm1668_vm14, %v363_v46, %v1098_v62  ;;  %v237_v57 = vadd.f32 %v233_v26, %v200_v52  ;;  %v315_v36 = vmul.f32 %v1004_v10, %v307_v51  ;;  %v352_v62 = vmul.f32 %v1061_v35, %v344_v41 }
 0x179   :  { %v478_v3 = vadd.f32 %v474_v60, %v437_v14  ;;  %v389_v0 = vsel %vm1022_vm8, %v367_v40, 0.0  ;;  %v449_v10 = vsel %vm1669_vm10, %v445_v33, %v1217_v16  ;;  %vm1670_vm14 = vcmp.lt.s32.totalorder %v937_v45, 112 }
 0x17a   :  { %v282_v27 = vadd.f32 %v278_v38, %v237_v57  ;;  %v397_v15 = vmul.f32 %v1072_v49, %v389_v0  ;;  %v412_v46 = vsel %vm1670_vm14, %v1170_v48, %v1152_v63  ;;  %v467_v24 = vsel %vm1289_vm6, %v449_v10, 0.0  ;;  %vm1671_vm14 = vmmov %vm1669_vm10 }
 0x17b   :  { %v482_v13 = vadd.f32 %v478_v3, %v863_v22  ;;  %v481_v35 = vadd.f32 %v1188_v6, %v863_v22  ;;  %v434_v49 = vmul.f32 %v1135_v21, %v412_v46  ;;  %v475_v63 = vmul.f32 %v1167_v25, %v467_v24  ;;  %vm1675_vm11 = vmmov %vm1671_vm14 }
 0x17c   :  { %v319_v30 = vadd.f32 %v315_v36, %v282_v27  ;;  %v484_v6 = vadd.f32 %v1254_v17, %v863_v22 }
 0x17d   :  { %v1339_v37 = vmax.f32 %v482_v13, 0.0  ;;  %v1373_v16 = vmax.f32 %v481_v35, 0.0  ;;  %v809_v35 = vmov 12  }
 0x17e   :  { %v356_v12 = vadd.f32 %v352_v62, %v319_v30  ;;  %v1384_v29 = vmax.f32 %v484_v6, 0.0  ;;  %787 = vset.pattern.permute.xlu1 %v809_v35  ;;  %788 = vset.pattern.permute.xlu0 %v809_v35 }
 0x17f   :  { %539 = vrot.lane.b32.xlu1 %v1339_v37, %s803_s27  ;;  %587 = vrot.lane.b32.xlu0 %v1339_v37, %s808_s5 }
 0x180   :  { %603 = vrot.lane.b32.xlu2 %v1339_v37, %s807_s30  ;;  %v401_v59 = vadd.f32 %v397_v15, %v356_v12 }
 0x182   :  { %v438_v48 = vadd.f32 %v434_v49, %v401_v59 }
 0x184   :  { %v479_v42 = vadd.f32 %v475_v63, %v438_v48 }
 0x186   :  { %v483_v21 = vadd.f32 %v479_v42, %v863_v22 }
 0x187   :  { %571 = vrot.lane.b32.xlu1 %v1339_v37, %s806_s29  ;;  %507 = vrot.lane.b32.xlu0 %v1339_v37, %s799_s1 }
 0x188   :  { %523 = vrot.lane.b32.xlu2 %v1339_v37, %s801_s2  ;;  %v1386_v25 = vmax.f32 %v483_v21, 0.0 }
 0x18f   :  { %491 = vrot.lane.b32.xlu0 %v1339_v37, %s797_s0  ;;  %601 = vrot.lane.b32.xlu1 %v1373_v16, %s807_s30 }
 0x190   :  { %555 = vrot.lane.b32.xlu2 %v1339_v37, %s804_s28 }
 0x197   :  { %589 = vrot.lane.b32.xlu0 %v1386_v25, %s808_s5  ;;  %607 = vrot.lane.b32.xlu1 %v1384_v29, %s807_s30 }
 0x198   :  { %605 = vrot.lane.b32.xlu2 %v1386_v25, %s807_s30 }
 0x19f   :  { %573 = vrot.lane.b32.xlu0 %v1386_v25, %s806_s29  ;;  %591 = vrot.lane.b32.xlu1 %v1384_v29, %s808_s5 }
 0x1a0   :  { %585 = vrot.lane.b32.xlu2 %v1373_v16, %s808_s5 }
 0x1a7   :  { %557 = vrot.lane.b32.xlu0 %v1386_v25, %s804_s28  ;;  %575 = vrot.lane.b32.xlu1 %v1384_v29, %s806_s29 }
 0x1a8   :  { %569 = vrot.lane.b32.xlu2 %v1373_v16, %s806_s29 }
 0x1af   :  { %543 = vrot.lane.b32.xlu0 %v1384_v29, %s803_s27  ;;  %559 = vrot.lane.b32.xlu1 %v1384_v29, %s804_s28 }
 0x1b0   :  { %553 = vrot.lane.b32.xlu2 %v1373_v16, %s804_s28 }
 0x1b7   :  { %525 = vrot.lane.b32.xlu0 %v1386_v25, %s801_s2  ;;  %527 = vrot.lane.b32.xlu1 %v1384_v29, %s801_s2 }
 0x1b8   :  { %541 = vrot.lane.b32.xlu2 %v1386_v25, %s803_s27 }
 0x1bf   :  { %537 = vrot.lane.b32.xlu0 %v1373_v16, %s803_s27  ;;  %509 = vrot.lane.b32.xlu1 %v1386_v25, %s799_s1 }
 0x1c0   :  { %511 = vrot.lane.b32.xlu2 %v1384_v29, %s799_s1 }
 0x1c7   :  { %489 = vrot.lane.b32.xlu0 %v1373_v16, %s797_s0  ;;  %493 = vrot.lane.b32.xlu1 %v1386_v25, %s797_s0 }
 0x1c8   :  { %495 = vrot.lane.b32.xlu2 %v1384_v29, %s797_s0 }
 0x1cf   :  { %521 = vrot.lane.b32.xlu1 %v1373_v16, %s801_s2 }
 0x1d0   :  { %505 = vrot.lane.b32.xlu2 %v1373_v16, %s799_s1 }
 0x1d7   :  { %619 = vperm.xlu1 %787, %v853_v7  }
 0x1da   :  { %v604_v22 = vpop.permute.xlu2 %603 }
 0x1e2   :  { %v1434_v17 = vpop.permute.xlu2 %523 }
 0x1ea   :  { %v556_v32 = vpop.permute.xlu2 %555 }
 0x1f1   :  { %v1436_v43 = vpop.permute.xlu1 %539  ;;  %v588_v31 = vpop.permute.xlu0 %587 }
 0x1f2   :  { %v606_v56 = vpop.permute.xlu2 %605 }
 0x1f3   :  { %v610_v33 = vsel %vm1669_vm10, %v604_v22, %v606_v56  ;;  %vm1672_vm10 = vcmp.lt.s32.totalorder %v937_v45, 112 }
 0x1f4   :  { %730 = vmatpush.msk.msrb.mxu1 %vm454_vm1, %v610_v33  ;;  %vm1673_vm1 = vcmp.lt.s32.totalorder %v937_v45, 113  ;;  %vm1674_vm9 = vmmov %vm1672_vm10 }
 0x1f9   :  { %v572_v20 = vpop.permute.xlu1 %571  ;;  %v1445_v4 = vpop.permute.xlu0 %507 }
 0x1fa   :  { %v586_v34 = vpop.permute.xlu2 %585 }
 0x1fb   :  { %v595_v11 = vsel %vm1672_vm10, %v586_v34, %v588_v31  ;;  %vm1676_vm10 = vcmp.lt.s32.totalorder %v937_v45, 127 }
 0x201   :  { %v1447_v8 = vpop.permute.xlu0 %491  ;;  %v602_v44 = vpop.permute.xlu1 %601 }
 0x202   :  { %v570_v14 = vpop.permute.xlu2 %569  ;;  %v611_v60 = vsel %vm1671_vm14, %v602_v44, %v604_v22 }
 0x203   :  { %722 = vmatpush.msk.msrb.mxu0 %vm1094_vm15, %v611_v60  ;;  %v579_v9 = vsel %vm1673_vm1, %v570_v14, %v572_v20 }
 0x205   :  { %634 = vmatpush.msrb.mxu0 %v595_v11 }
 0x207   :  { %723 = vmatpush.msk.msrb.mxu0 %vm1079_vm12, %v579_v9 }
 0x209   :  { %v590_v3 = vpop.permute.xlu0 %589  ;;  %v608_v28 = vpop.permute.xlu1 %607 }
 0x20a   :  { %v554_v47 = vpop.permute.xlu2 %553  ;;  %v594_v26 = vsel %vm1674_vm9, %v588_v31, %v590_v3  ;;  %v609_v53 = vsel %vm1671_vm14, %v606_v56, %v608_v28  ;;  %v612_v13 = vsel %vm1675_vm11, %v608_v28, %v602_v44  ;;  %vm1677_vm9 = vmand %vm1195_vm4, %vm1184_vm0 }
 0x20b   :  { %v563_v51 = vsel %vm1676_vm10, %v554_v47, %v556_v32  ;;  %731 = vmatpush.msk.msrb.mxu1 %vm1256_vm3, %v594_v26  ;;  %738 = vmatpush.msk.msrb.mxu2 %vm1289_vm6, %v609_v53  ;;  %vm1678_vm11 = vmmov %vm1673_vm1  ;;  %vm1679_vm1 = vcmp.lt.s32.totalorder %v937_v45, 112 }
 0x20c   :  { %724 = vmatpush.msk.msrb.mxu0 %vm1094_vm15, %v563_v51  ;;  %746 = vmatpush.msk.msrb.mxu3 %vm1677_vm9, %v612_v13  ;;  %vm1680_vm14 = vmmov %vm1679_vm1  ;;  %vm1682_vm9 = vcmp.lt.s32.totalorder %v937_v45, 127 }
 0x20d   :  { %vm1681_vm10 = vmand %vm1256_vm3, %vm956_vm2 }
 0x20e   :  { %637 = vmatpush.msrb.mxu0 %v1373_v16  ;;  %vm1684_vm3 = vmand %vm1195_vm4, %vm1086_vm13 }
 0x211   :  { %v574_v52 = vpop.permute.xlu0 %573  ;;  %v592_v38 = vpop.permute.xlu1 %591 }
 0x212   :  { %v578_v40 = vsel %vm1678_vm11, %v572_v20, %v574_v52  ;;  %v593_v41 = vsel %vm1679_vm1, %v590_v3, %v592_v38  ;;  %v596_v57 = vsel %vm1680_vm14, %v592_v38, %v586_v34  ;;  %vm1683_vm1 = vmmov %vm1678_vm11  ;;  %v542_v46 = vpop.permute.xlu2 %541 }
 0x213   :  { %732 = vmatpush.msk.msrb.mxu1 %vm1681_vm10, %v578_v40  ;;  %674 = vmatpush.msrb.mxu2 %v593_v41  ;;  %vm1685_vm14 = vmmov %vm1682_vm9 }
 0x214   :  { %747 = vmatpush.msk.msrb.mxu3 %vm1195_vm4, %v596_v57  ;;  %vm1686_vm10 = vmmov %vm1682_vm9  ;;  %vm1687_vm4 = vcmp.lt.s32.totalorder %v937_v45, 1 }
 0x215   :  { %v546_v39 = vsel %vm1687_vm4, %v1436_v43, %v542_v46 }
 0x219   :  { %v558_v36 = vpop.permute.xlu0 %557  ;;  %v576_v0 = vpop.permute.xlu1 %575 }
 0x21a   :  { %v562_v27 = vsel %vm1682_vm9, %v556_v32, %v558_v36  ;;  %v577_v62 = vsel %vm1678_vm11, %v574_v52, %v576_v0  ;;  %v580_v30 = vsel %vm1683_vm1, %v576_v0, %v570_v14  ;;  %vm1688_vm9 = vmmov %vm1687_vm4  ;;  %vm1689_vm11 = vcmp.lt.s32.totalorder %v937_v45, 15  ;;  %v512_v48 = vpop.permute.xlu2 %511 }
 0x21b   :  { %733 = vmatpush.msk.msrb.mxu1 %vm988_vm5, %v562_v27  ;;  %739 = vmatpush.msk.msrb.mxu2 %vm1022_vm8, %v577_v62  ;;  %vm1690_vm1 = vmmov %vm1689_vm11 }
 0x21c   :  { %748 = vmatpush.msk.msrb.mxu3 %vm1684_vm3, %v580_v30  ;;  %vm1691_vm3 = vmand %vm1016_vm7, %vm1289_vm6 }
 0x21d   :  { %657 = vmatpush.msrb.mxu1 %v1339_v37 }
 0x221   :  { %v544_v23 = vpop.permute.xlu0 %543  ;;  %v560_v15 = vpop.permute.xlu1 %559 }
 0x222   :  { %v561_v10 = vsel %vm1685_vm14, %v558_v36, %v560_v15  ;;  %v564_v12 = vsel %vm1686_vm10, %v560_v15, %v554_v47  ;;  %v545_v37 = vsel %vm1688_vm9, %v542_v46, %v544_v23  ;;  %vm1692_vm14 = vmmov %vm1687_vm4  ;;  %v496_v5 = vpop.permute.xlu2 %495  ;;  %vm1696_vm9 = vcmp.lt.s32.totalorder %v937_v45, 17 }
 0x223   :  { %740 = vmatpush.msk.msrb.mxu2 %vm1289_vm6, %v561_v10  ;;  %749 = vmatpush.msk.msrb.mxu3 %vm1184_vm0, %v564_v12  ;;  %vm1693_vm10 = vmmov %vm1687_vm4  ;;  %vm1694_vm4 = vcmp.lt.s32.totalorder %v937_v45, 16 }
 0x224   :  { %vm1695_vm6 = vmmov %vm1694_vm4 }
 0x225   :  { %677 = vmatpush.msrb.mxu2 %v1386_v25  ;;  %697 = vmatpush.msrb.mxu3 %v1384_v29  ;;  %v617_v25 = vld [vmem:[%s1621_s3] sm:$0xff] }
 0x227   :  { %741 = vmatpush.msk.msrb.mxu2 %vm1022_vm8, %v546_v39  ;;  %750 = vmatpush.msk.msrb.mxu3 %vm1086_vm13, %v545_v37 }
 0x229   :  { %v526_v24 = vpop.permute.xlu0 %525  ;;  %v528_v59 = vpop.permute.xlu1 %527 }
 0x22a   :  { %v530_v49 = vsel %vm1689_vm11, %v1434_v17, %v526_v24  ;;  %v529_v63 = vsel %vm1690_vm1, %v526_v24, %v528_v59  ;;  %vm1697_vm11 = vmmov %vm1696_vm9 }
 0x22b   :  { %742 = vmatpush.msk.msrb.mxu2 %vm1691_vm3, %v530_v49  ;;  %751 = vmatpush.msk.msrb.mxu3 %vm1184_vm0, %v529_v63  ;;  %vm622_vm0 = vcmask 588800   ;;  %vm1698_vm1 = vmand %vm1016_vm7, %vm1022_vm8  ;;  %vm1699_vm3 = vcmp.lt.s32.totalorder %v937_v45, 15 }
 0x231   :  { %v538_v16 = vpop.permute.xlu0 %537  ;;  %v510_v42 = vpop.permute.xlu1 %509 }
 0x232   :  { %v548_v6 = vsel %vm1692_vm14, %v544_v23, %v538_v16  ;;  %v547_v21 = vsel %vm1693_vm10, %v538_v16, %v1436_v43  ;;  %v514_v7 = vsel %vm1694_vm4, %v1445_v4, %v510_v42  ;;  %v513_v2 = vsel %vm1695_vm6, %v510_v42, %v512_v48  ;;  %v506_v43 = vpop.permute.xlu2 %505  ;;  %vm1700_vm14 = vmmov %vm1699_vm3 }
 0x233   :  { %725 = vmatpush.msk.msrb.mxu0 %vm1079_vm12, %v548_v6  ;;  %734 = vmatpush.msk.msrb.mxu1 %vm956_vm2, %v547_v21  ;;  %vm1704_vm10 = vmmov %vm1694_vm4 }
 0x234   :  { %743 = vmatpush.msk.msrb.mxu2 %vm1016_vm7, %v514_v7  ;;  %700 = vmatpush.msrb.mxu3 %v513_v2  ;;  %vm1701_vm7 = vnez %v1649_v54  ;;  %v515_v58 = vsel %vm1704_vm10, %v506_v43, %v1445_v4 }
 0x235   :  { %vm1702_vm8 = vmand %vm1701_vm7, %vm1094_vm15 }
 0x239   :  { %v494_v29 = vpop.permute.xlu1 %493  ;;  %v490_v33 = vpop.permute.xlu0 %489 }
 0x23a   :  { %v498_v22 = vsel %vm1696_vm9, %v1447_v8, %v494_v29  ;;  %v497_v32 = vsel %vm1697_vm11, %v494_v29, %v496_v5 }
 0x23b   :  { %744 = vmatpush.msk.msrb.mxu2 %vm1698_vm1, %v498_v22  ;;  %752 = vmatpush.msk.msrb.mxu3 %vm1086_vm13, %v497_v32  ;;  %vm1703_vm13 = vmmov %vm1694_vm4 }
 0x23c   :  { %745 = vmatmul.msk.f32.vlgmr.msrb.gmra.mxu2 %vm622_vm0, %v617_v25  ;;  %753 = vmatmul.msk.f32.vlgmr.msrb.gmra.mxu3 %vm622_vm0, %v617_v25  ;;  %v516_v19 = vsel %vm1703_vm13, %v512_v48, %v506_v43  ;;  %vm1705_vm4 = vmmov %vm1696_vm9 }
 0x23d   :  { %vm1706_vm15 = vmmov %vm1705_vm4 }
 0x23e   :  { %v499_v61 = vsel %vm1706_vm15, %v490_v33, %v1447_v8 }
 0x241   :  { %v522_v31 = vpop.permute.xlu1 %521 }
 0x242   :  { %v532_v56 = vsel %vm1699_vm3, %v528_v59, %v522_v31  ;;  %v531_v18 = vsel %vm1700_vm14, %v522_v31, %v1434_v17  ;;  %v500_v17 = vsel %vm1705_vm4, %v496_v5, %v490_v33 }
 0x243   :  { %726 = vmatpush.msk.msrb.mxu0 %vm1702_vm8, %v532_v56  ;;  %735 = vmatpush.msk.msrb.mxu1 %vm988_vm5, %v531_v18  ;;  %vm1707_vm5 = vmand %vm1701_vm7, %vm1079_vm12 }
 0x245   :  { %727 = vmatpush.msk.msrb.mxu0 %vm1701_vm7, %v516_v19  ;;  %660 = vmatpush.msrb.mxu1 %v515_v58 }
 0x247   :  { %728 = vmatpush.msk.msrb.mxu0 %vm1707_vm5, %v500_v17  ;;  %736 = vmatpush.msk.msrb.mxu1 %vm956_vm2, %v499_v61 }
 0x248   :  { %729 = vmatmul.msk.f32.vlgmr.msrb.gmra.mxu0 %vm622_vm0, %v617_v25  ;;  %737 = vmatmul.msk.f32.vlgmr.msrb.gmra.mxu1 %vm622_vm0, %v617_v25 }
 0x249   :  { %v620_v1 = vpop.permute.xlu1 %619 }
 0x2bf   :  { %v683_v20 = vpop.f32.mrf.mxu2  ;;  %v703_v4 = vpop.f32.mrf.mxu3 }
 0x2c0   :  { %v684_v34 = vadd.f32 %v683_v20, %v620_v1  ;;  %v704_v44 = vadd.f32 %v703_v4, %v620_v1 }
 0x2c2   :  { %v708_v45 = vmax.f32 %v684_v34, 0.0  ;;  %v709_v8 = vmax.f32 %v704_v44, 0.0 }
 0x2c4   :  { %712 = vst [vmem:[%s1622_s4 + $0x10] sm:$0xff] %v708_v45 }
 0x2c5   :  { %v643_v54 = vpop.f32.mrf.mxu0  ;;  %v663_v55 = vpop.f32.mrf.mxu1  ;;  %713 = vst [vmem:[%s1622_s4 + $0x18] sm:$0xff] %v709_v8 }
 0x2c6   :  { %v644_v50 = vadd.f32 %v643_v54, %v620_v1  ;;  %v664_v14 = vadd.f32 %v663_v55, %v620_v1 }
 0x2c8   :  { %v706_v60 = vmax.f32 %v644_v50, 0.0  ;;  %v707_v11 = vmax.f32 %v664_v14, 0.0 }
 0x2ca   :  { %710 = vst [vmem:[%s1622_s4] sm:$0xff] %v706_v60 }
 0x2cb   :  { %711 = vst [vmem:[%s1622_s4 + $0x8] sm:$0xff] %v707_v11 }

</bundles_post_ra>
